<compile_context>
chip_gen: v6e
topology: v6e:2x2x1
jax: 0.10.0
libtpu: 0.0.40
codegen_flags: <defaults>
</compile_context>

<pallas_src>
import math
import functools

import jax
import jax.numpy as jnp
from jax import lax
from jax.experimental import pallas as pl
from jax.experimental.pallas import tpu as pltpu


def make_sinusoidal_pe(max_len: int, d_model: int, dtype=jnp.float32):
    """Builds the (max_len, d_model) sinusoidal table exactly like the PyTorch __init__."""
    position = jnp.arange(max_len, dtype=jnp.float32)[:, None]                  # (max_len, 1)
    div_term = jnp.exp(jnp.arange(0, d_model, 2, dtype=jnp.float32)
                       * (-math.log(10000.0) / d_model))                        # (d_model//2,)
    pe = jnp.zeros((max_len, d_model), dtype=jnp.float32)
    pe = pe.at[:, 0::2].set(jnp.sin(position * div_term))
    pe = pe.at[:, 1::2].set(jnp.cos(position * div_term))
    return pe.astype(dtype)


def _mix32(h):
    # "lowbias32" integer finalizer: cheap VALU-only mixing, uint32 wraparound.
    h = h ^ (h >> 16)
    h = h * jnp.uint32(0x7FEB352D)
    h = h ^ (h >> 15)
    h = h * jnp.uint32(0x846CA68B)
    h = h ^ (h >> 16)
    return h


def _pos_enc_kernel(seed_ref, x_ref, pe_ref, o_ref, *, p: float, training: bool, tile_f: int):
    # x_ref : (B, TF) VMEM block    pe_ref: (1, TF) VMEM block    o_ref: (B, TF)
    y = x_ref[...] + pe_ref[...]                    # broadcast add in native dtype

    if training and p > 0.0:
        # Counter-based hash PRNG: unique stream per (seed, row, absolute column),
        # independent of grid iteration order (safe with "parallel" semantics).
        shape = y.shape
        col_off = pl.program_id(0) * tile_f
        rows = lax.broadcasted_iota(jnp.int32, shape, 0).astype(jnp.uint32)
        cols = (lax.broadcasted_iota(jnp.int32, shape, 1) + col_off).astype(jnp.uint32)
        seed = seed_ref[0].astype(jnp.uint32)

        h = _mix32(cols ^ (seed * jnp.uint32(0x9E3779B1)))
        h = _mix32(h ^ (rows * jnp.uint32(0x85EBCA77)) ^ jnp.uint32(0xC2B2AE3D))

        # Integer-threshold keep mask: P(keep) = 1 - p (no u32->f32 convert chain).
        thr = jnp.uint32(min(int(round((1.0 - p) * 2.0 ** 32)), 2 ** 32 - 1))
        keep = h < thr
        scale = jnp.asarray(1.0 / (1.0 - p), dtype=y.dtype)
        y = jnp.where(keep, y * scale, jnp.zeros((), dtype=y.dtype))

    o_ref[...] = y.astype(o_ref.dtype)


def _choose_tile_f(F: int, B: int, itemsize: int, target_block_bytes: int = 2 * 1024 * 1024):
    """Largest TF that divides F, is a multiple of 128 (lane dense) and keeps one
    (B, TF) block around ~target_block_bytes. Falls back to the full F."""
    if F % 128 != 0:
        return F
    max_tf = max(128, target_block_bytes // max(1, B * itemsize))
    if F <= max_tf:
        return F
    n = F // 128
    best = 128
    d = 1
    while d * d <= n:
        if n % d == 0:
            for cand in (d, n // d):
                tf = cand * 128
                if best < tf <= max_tf:
                    best = tf
        d += 1
    return best


def positional_encoding(x, pe_table, *, p: float = 0.1, training: bool = False, seed: int = 0):
    """x: (B, S, D).  pe_table: (max_len, D).  Returns dropout(x + pe[:S])."""
    B, S, D = x.shape
    F = S * D
    x_flat = x.reshape(B, F)                                  # lane-dense last dim
    pe_flat = pe_table[:S].astype(x.dtype).reshape(1, F)      # broadcast over batch
    seed_arr = jnp.array([seed], dtype=jnp.int32)

    itemsize = jnp.dtype(x.dtype).itemsize
    TF = _choose_tile_f(F, B, itemsize)
    grid = (F // TF,)

    kernel = functools.partial(_pos_enc_kernel, p=p, training=training, tile_f=TF)

    cost = pl.CostEstimate(
        flops=2 * B * F,
        transcendentals=0,
        bytes_accessed=(2 * B * F + F) * itemsize,   # read x + write out + read pe once
    )

    out_flat = pl.pallas_call(
        kernel,
        out_shape=jax.ShapeDtypeStruct((B, F), x.dtype),
        grid_spec=pltpu.PrefetchScalarGridSpec(
            num_scalar_prefetch=1,                    # seed lands in SMEM
            grid=grid,
            in_specs=[
                pl.BlockSpec((B, TF), lambda t, seed: (0, t)),
                pl.BlockSpec((1, TF), lambda t, seed: (0, t)),
            ],
            out_specs=pl.BlockSpec((B, TF), lambda t, seed: (0, t)),
        ),
        compiler_params=pltpu.CompilerParams(
            dimension_semantics=("parallel",),        # independent tiles -> 2 TCs on v7x
            vmem_limit_bytes=48 * 1024 * 1024,        # headroom under v7x's 64 MiB VMEM
        ),
        cost_estimate=cost,
    )(seed_arr, x_flat, pe_flat)

    return out_flat.reshape(B, S, D)


if __name__ == "__main__":
    d_model = 32
    max_len = 64
    batch, seq = 2, 8
    p_drop = 0.1

    key = jax.random.PRNGKey(0)
    x = jax.random.normal(key, (batch, seq, d_model), dtype=jnp.float32)
    pe_table = make_sinusoidal_pe(max_len, d_model)

    # Eval-mode forward (dropout is identity) — exact semantics check.
    out_eval = positional_encoding(x, pe_table, p=p_drop, training=False)
    jax.block_until_ready(out_eval)
    ref = x + pe_table[:seq][None, :, :]
    assert out_eval.shape == x.shape
    assert jnp.allclose(out_eval, ref, atol=1e-5, rtol=1e-5), "eval-mode mismatch"

    # Training-mode forward (inverted dropout via in-kernel hash PRNG).
    out_train = positional_encoding(x, pe_table, p=p_drop, training=True, seed=42)
    jax.block_until_ready(out_train)
    assert out_train.shape == x.shape
    scale = 1.0 / (1.0 - p_drop)
    ok = jnp.isclose(out_train, 0.0, atol=1e-6) | jnp.isclose(
        out_train, ref * scale, atol=1e-4, rtol=1e-4)
    assert bool(jnp.all(ok)), "training-mode values must be 0 or scaled (x + pe)"
    kept = float(jnp.mean((out_train != 0.0).astype(jnp.float32)))
    assert 0.5 < kept < 1.0, f"unexpected dropout keep fraction {kept}"

    print("KERNEL_OK")
</pallas_src>

<mosaic_0001>
module attributes {stable_mosaic.version = 11 : i64} {
  func.func @_pos_enc_kernel(%arg0: i32, %arg1: memref<1xi32, #tpu.memory_space<smem>>, %arg2: memref<2x256xf32, #tpu.memory_space<vmem>>, %arg3: memref<1x256xf32, #tpu.memory_space<vmem>>, %arg4: memref<2x256xf32, #tpu.memory_space<vmem>>) attributes {dimension_semantics = [#tpu.dimension_semantics<parallel>], iteration_bounds = array<i64: 1>, scalar_prefetch = 1 : i64, scratch_operands = 0 : i64, tpu.core_type = #tpu.core_type<tc>, window_params = [{transform_indices = @transform_0, window_bounds = array<i64: 2, 256>}, {transform_indices = @transform_1, window_bounds = array<i64: 1, 256>}, {transform_indices = @transform_2, window_bounds = array<i64: 2, 256>}]} {
    %c0 = arith.constant 0 : index
    %c0_0 = arith.constant 0 : index
    %0 = vector.load %arg2[%c0, %c0_0] : memref<2x256xf32, #tpu.memory_space<vmem>>, vector<2x256xf32>
    %c0_1 = arith.constant 0 : index
    %c0_2 = arith.constant 0 : index
    %1 = vector.load %arg3[%c0_1, %c0_2] : memref<1x256xf32, #tpu.memory_space<vmem>>, vector<1x256xf32>
    %2 = vector.broadcast %1 : vector<1x256xf32> to vector<2x256xf32>
    %3 = arith.addf %0, %2 : vector<2x256xf32>
    %c0_3 = arith.constant 0 : index
    %c0_4 = arith.constant 0 : index
    %4 = vector.load %arg4[%c0_3, %c0_4] : memref<2x256xf32, #tpu.memory_space<vmem>>, vector<2x256xf32>
    tpu.vector_store %arg4[%c0_3, %c0_4], %3 {strides = array<i32>} : memref<2x256xf32, #tpu.memory_space<vmem>>, vector<2x256xf32>,
    return
  }
  func.func @transform_0(%arg0: i32, %arg1: memref<1xi32, #tpu.memory_space<smem>>) -> (i32, i32) {
    %c0_i32 = arith.constant 0 : i32
    %c0_i32_0 = arith.constant 0 : i32
    return %c0_i32, %arg0 : i32, i32
  }
  func.func @transform_1(%arg0: i32, %arg1: memref<1xi32, #tpu.memory_space<smem>>) -> (i32, i32) {
    %c0_i32 = arith.constant 0 : i32
    %c0_i32_0 = arith.constant 0 : i32
    return %c0_i32, %arg0 : i32, i32
  }
  func.func @transform_2(%arg0: i32, %arg1: memref<1xi32, #tpu.memory_space<smem>>) -> (i32, i32) {
    %c0_i32 = arith.constant 0 : i32
    %c0_i32_0 = arith.constant 0 : i32
    return %c0_i32, %arg0 : i32, i32
  }
}

</mosaic_0001>

<bundles_post_ra>
// kernel: tpu_custom_call.1
= control target key start
LH: loop header
LB: loop body
LE: loop exit
PB: predicated region body
PF: predicated region fallthrough
CT: control target
= control target key end

     0   :  { %9 = vsyncpa [#allocation5], 0  ;;  %s142_s0 = inlined_call_operand.<no memory space> [shape: s32[1], index: 0, kind: input, shape index: {}]   ;;  %s143_s1 = inlined_call_operand.hbm [shape: f32[2,256], index: 1, kind: input, shape index: {}]   ;;  %s144_s2 = inlined_call_operand.vmem [shape: f32[1,256], index: 2, kind: input, shape index: {}]   ;;  %s145_s3 = inlined_call_operand.hbm [shape: f32[2,256], index: 3, kind: output, shape index: {}]  }
   0x1   :  { %10 = vsyncpa [#allocation6], 0  ;;  %s110_s12 = smov [#allocation4]  }
   0x2   :  { %s17_s13 = sshll.u32 %s110_s12, 4  ;;  %s18_s13 = int_to_ptr.vmem [resolvable:$true] %s17_s13 }
   0x3   :  { %s74_s14 = scalar_lea.vmem %s18_s13, 64  ;;  %p79_p1 = scmp.lt.s32.totalorder %s18_s13, %s18_s13 }
   0x4   :  { %p75_p0 = scmp.ne.s32.totalorder %s18_s13, %s74_s14  ;;  %p80_p2 = scmp.lt.s32.totalorder %s74_s14, %s74_s14 }
   0x6   :  { %p81_p3 = por %p80_p2, %p79_p1 }
   0x8   :  { %p82_p4 = pnand %p81_p3, %p75_p0 }
   0xa   :  { %85 = shalt.err (!%p82_p4)
}
   0xb   :  { %20 = dma.hbm_to_vmem [thread:$0]  %s143_s1, 64, %s18_s13, [#allocation5]  }
   0xc   :  { %106 = dma.done.wait [#allocation5], 64  }
   0xd   :  { %107 = vsyncadd [#allocation5], 4294967232  ;;  %v29_v0 = vlaneseq  ;;  %v111_v1 = vmov 1983009808   ;;  %v27_v7 = vld [vmem:[%s144_s2] sm:$0x3] }
   0xe   :  { %v39_v2 = vunpack.c.l.s4 %v111_v1  ;;  %v26_v12 = vld [vmem:[#allocation4] sm:$0xf]  ;;  %s112_s18 = smov [#allocation7]  }
   0xf   :  { %v30_v3 = vshrl.u32 %v29_v0, 7  ;;  %s54_s1 = sshll.u32 %s112_s18, 4  ;;  %s55_s1 = int_to_ptr.vmem [resolvable:$true] %s54_s1 }
  0x10   :  { %v40_v6 = vunpack.c.0.s8 %v39_v2  ;;  %s86_s19 = scalar_lea.vmem %s55_s1, 64  ;;  %p91_p6 = scmp.lt.s32.totalorder %s55_s1, %s55_s1 }
  0x11   :  { %v31_v4 = vsub.s32 0, %v30_v3  ;;  %v35_v5 = vsub.s32 1, %v30_v3  ;;  %p87_p5 = scmp.ne.s32.totalorder %s55_s1, %s86_s19  ;;  %p92_p7 = scmp.lt.s32.totalorder %s86_s19, %s86_s19 }
  0x12   :  { %v43_v10 = vsub.s32 %v40_v6, %v30_v3 }
  0x13   :  { %v32_v8 = vrot.slane %v27_v7, %v31_v4  ;;  %v36_v9 = vrot.slane %v27_v7, %v35_v5  ;;  %p93_p8 = por %p92_p7, %p91_p6 }
  0x15   :  { %v37_v11 = vcombine.low %v32_v8, %v36_v9  ;;  %p94_p9 = pnand %p93_p8, %p87_p5 }
  0x17   :  { %v44_v13 = vrot.slane %v37_v11, %v43_v10 }
  0x19   :  { %v46_v14 = vadd.f32 %v44_v13, %v26_v12 }
  0x1b   :  { %47 = vst [vmem:[#allocation7] sm:$0xf] %v46_v14 }
  0x1c   :  { %97 = shalt.err (!%p94_p9)
}
  0x1d   :  { %57 = dma.vmem_to_hbm [thread:$0]  %s55_s1, 64, %s145_s3, [#allocation6]  }
  0x1e   :  { %108 = dma.done.wait [#allocation6], 64  }
  0x1f   :  { %109 = vsyncadd [#allocation6], 4294967232 }
  0x20   :  { %61 = vsyncpa [#allocation5], 1 }
  0x21   :  { %62 = vsyncpa [#allocation6], 1 }

</bundles_post_ra>
